<compile_context>
chip_gen: v6e
topology: v6e:2x2x1
jax: 0.10.0
libtpu: 0.0.40
codegen_flags: <defaults>
</compile_context>

<pallas_src>
import functools

import jax
import jax.numpy as jnp
from jax import lax
from jax.experimental import pallas as pl
from jax.experimental.pallas import tpu as pltpu


def _round_up(x, m):
    return (x + m - 1) // m * m


def _auto_block_rows(n, v, itemsize, vmem_budget=16 * 1024 * 1024):
    """Largest row block whose double-buffered logits tile fits the budget."""
    per_row = 2 * v * itemsize            # x2: Pallas double-buffers the input block
    rows = max(8, min(_round_up(n, 8), vmem_budget // per_row))
    rows = max(8, (rows // 8) * 8)        # keep sublane-aligned
    return int(min(rows, 2048))           # past ~512 rows per-step overhead is amortized


def _label_smoothing_kernel(logits_ref, tgt_ref, out_ref, *,
                            vocab_size, padding_idx, smoothing,
                            n_rows, block_rows):
    i = pl.program_id(0)

    x = logits_ref[...].astype(jnp.float32)          # (TM, V), upcast (bf16 ok)
    tgt = tgt_ref[...]                               # (TM, 1) int32

    # Row log-partition: z = max + log(sum(exp(x - max)))
    m = jnp.max(x, axis=-1, keepdims=True)           # (TM, 1)
    sum_exp = jnp.sum(jnp.exp(x - m), axis=-1, keepdims=True)
    z = m + jnp.log(sum_exp)                          # (TM, 1)

    # Pieces needed for the algebraic form (no true_dist materialization):
    sum_x = jnp.sum(x, axis=-1, keepdims=True)                        # (TM, 1)
    col = lax.broadcasted_iota(jnp.int32, x.shape, 1)                 # (TM, V)
    x_tgt = jnp.sum(jnp.where(col == tgt, x, 0.0), axis=-1, keepdims=True)
    x_pad = x[:, padding_idx:padding_idx + 1]                         # static lane slice

    confidence = 1.0 - smoothing
    eps = smoothing / (vocab_size - 1)

    lsm_tgt = x_tgt - z
    lsm_pad = x_pad - z
    sum_lsm = sum_x - vocab_size * z

    # Per-row loss for non-pad rows:
    #   -(conf*lsm[tgt] + eps*(sum_lsm - lsm[tgt] - lsm[pad]))
    row_loss = -((confidence - eps) * lsm_tgt + eps * (sum_lsm - lsm_pad))  # (TM,1)

    # Mask padded targets and out-of-range rows of a partial final block.
    row_idx = i * block_rows + lax.broadcasted_iota(jnp.int32, (block_rows, 1), 0)
    valid = (tgt != padding_idx) & (row_idx < n_rows)
    partial = jnp.sum(jnp.where(valid, row_loss, 0.0))               # scalar

    # Independent per-block partial sum -> (8,128) tile (legal, lane-dense).
    out_ref[...] = jnp.full((8, 128), partial, dtype=jnp.float32)


def label_smoothing_loss(logits, target, *, vocab_size, padding_idx,
                         smoothing=0.1, block_rows=None):
    """logits: (N, V) float32/bfloat16; target: (N,) int — returns scalar mean loss."""
    n, v = logits.shape
    assert v == vocab_size
    itemsize = jnp.dtype(logits.dtype).itemsize

    if block_rows is None:
        block_rows = _auto_block_rows(n, v, itemsize)
    assert block_rows % 8 == 0, "block_rows must be a multiple of 8"

    num_blocks = pl.cdiv(n, block_rows)
    tgt2d = target.astype(jnp.int32).reshape(n, 1)

    kernel = functools.partial(
        _label_smoothing_kernel,
        vocab_size=v,
        padding_idx=int(padding_idx),
        smoothing=float(smoothing),
        n_rows=n,
        block_rows=block_rows,
    )

    # Double-buffered working set: logits tile + target tile + output tile.
    working = 2 * (block_rows * v * itemsize + block_rows * 4 + 8 * 128 * 4)
    vmem_limit = None
    if working > 16 * 1024 * 1024:
        vmem_limit = int(min(working + (4 << 20), 48 * 1024 * 1024))

    # TODO(synk): for very large V (>64k), tile the vocab axis with an online
    # logsumexp carry instead of loading a full (block_rows, V) row block.

    out = pl.pallas_call(
        kernel,
        out_shape=jax.ShapeDtypeStruct((num_blocks * 8, 128), jnp.float32),
        grid_spec=pltpu.PrefetchScalarGridSpec(
            num_scalar_prefetch=0,
            grid=(num_blocks,),
            in_specs=[
                pl.BlockSpec((block_rows, v), lambda i: (i, 0)),
                pl.BlockSpec((block_rows, 1), lambda i: (i, 0)),
            ],
            out_specs=pl.BlockSpec((8, 128), lambda i: (i, 0)),
        ),
        compiler_params=pltpu.CompilerParams(
            dimension_semantics=("parallel",),
            vmem_limit_bytes=vmem_limit),
    )(logits, tgt2d)

    partials = out[::8, 0]                 # one partial sum per block
    return jnp.sum(partials) / jnp.float32(n)


def _reference(logits, target, vocab_size, padding_idx, smoothing):
    confidence = 1.0 - smoothing
    eps = smoothing / (vocab_size - 1)
    lsm = jax.nn.log_softmax(logits.astype(jnp.float32), axis=-1)
    td = jnp.full_like(lsm, eps)
    td = td.at[jnp.arange(logits.shape[0]), target].set(confidence)
    td = td.at[:, padding_idx].set(0.0)
    td = jnp.where((target == padding_idx)[:, None], 0.0, td)
    return jnp.mean(jnp.sum(-td * lsm, axis=-1))


if __name__ == "__main__":
    VOCAB, PAD, SMOOTH = 128, 0, 0.1
    BATCH, SEQ = 5, 8                      # N = 40 rows
    N = BATCH * SEQ

    key = jax.random.PRNGKey(0)
    k_logits, k_tgt, k_mask = jax.random.split(key, 3)

    logits = jax.random.normal(k_logits, (N, VOCAB), dtype=jnp.float32)
    target = jax.random.randint(k_tgt, (N,), 1, VOCAB, dtype=jnp.int32)
    pad_mask = jax.random.bernoulli(k_mask, 0.25, (N,))
    target = jnp.where(pad_mask, PAD, target)      # exercise pad-row masking

    ref_f32 = _reference(logits, target, VOCAB, PAD, SMOOTH)

    # 1) auto-sized block (single block covering all rows)
    loss1 = jax.block_until_ready(label_smoothing_loss(
        logits, target, vocab_size=VOCAB, padding_idx=PAD, smoothing=SMOOTH))
    assert jnp.allclose(loss1, ref_f32, rtol=1e-5, atol=1e-4), (loss1, ref_f32)

    # 2) multi-block "parallel" grid with a partial final block (40 rows / 16-row blocks)
    loss2 = jax.block_until_ready(label_smoothing_loss(
        logits, target, vocab_size=VOCAB, padding_idx=PAD, smoothing=SMOOTH,
        block_rows=16))
    assert jnp.allclose(loss2, ref_f32, rtol=1e-5, atol=1e-4), (loss2, ref_f32)

    # 3) bf16 logits streamed through the DMA, upcast inside the kernel
    logits_bf16 = logits.astype(jnp.bfloat16)
    ref_bf16 = _reference(logits_bf16.astype(jnp.float32), target, VOCAB, PAD, SMOOTH)
    loss3 = jax.block_until_ready(label_smoothing_loss(
        logits_bf16, target, vocab_size=VOCAB, padding_idx=PAD, smoothing=SMOOTH,
        block_rows=16))
    assert jnp.allclose(loss3, ref_bf16, rtol=1e-5, atol=1e-4), (loss3, ref_bf16)

    print("KERNEL_OK")
</pallas_src>

<mosaic_0001>
module attributes {stable_mosaic.version = 11 : i64} {
  func.func @_label_smoothing_kernel(%arg0: i32, %arg1: memref<40x128xf32, #tpu.memory_space<vmem>>, %arg2: memref<40x1xi32, #tpu.memory_space<vmem>>, %arg3: memref<8x128xf32, #tpu.memory_space<vmem>>) attributes {dimension_semantics = [#tpu.dimension_semantics<parallel>], iteration_bounds = array<i64: 1>, scalar_prefetch = 0 : i64, scratch_operands = 0 : i64, tpu.core_type = #tpu.core_type<tc>, window_params = [{transform_indices = @transform_0, window_bounds = array<i64: 40, 128>}, {transform_indices = @transform_1, window_bounds = array<i64: 40, 1>}, {transform_indices = @transform_2, window_bounds = array<i64: 8, 128>}]} {
    %c0 = arith.constant 0 : index
    %c0_0 = arith.constant 0 : index
    %0 = vector.load %arg1[%c0, %c0_0] : memref<40x128xf32, #tpu.memory_space<vmem>>, vector<40x128xf32>
    %c0_1 = arith.constant 0 : index
    %c0_2 = arith.constant 0 : index
    %1 = vector.load %arg2[%c0_1, %c0_2] : memref<40x1xi32, #tpu.memory_space<vmem>>, vector<40x1xi32>
    %cst = arith.constant dense<0xFF800000> : vector<40xf32>
    %2 = vector.multi_reduction <maximumf>, %0, %cst [1] : vector<40x128xf32> to vector<40xf32>
    %3 = vector.shape_cast %2 : vector<40xf32> to vector<40x1xf32>
    %4 = vector.broadcast %3 : vector<40x1xf32> to vector<40x128xf32>
    %5 = arith.subf %0, %4 : vector<40x128xf32>
    %6 = math.exp %5 : vector<40x128xf32>
    %cst_3 = arith.constant dense<0.000000e+00> : vector<40xf32>
    %7 = vector.multi_reduction <add>, %6, %cst_3 [1] : vector<40x128xf32> to vector<40xf32>
    %8 = vector.shape_cast %7 : vector<40xf32> to vector<40x1xf32>
    %9 = math.log %8 : vector<40x1xf32>
    %10 = arith.addf %3, %9 : vector<40x1xf32>
    %cst_4 = arith.constant dense<0.000000e+00> : vector<40xf32>
    %11 = vector.multi_reduction <add>, %0, %cst_4 [1] : vector<40x128xf32> to vector<40xf32>
    %12 = vector.shape_cast %11 : vector<40xf32> to vector<40x1xf32>
    %13 = tpu.iota {dimensions = array<i32: 1>} : vector<40x128xi32>
    %14 = vector.broadcast %1 : vector<40x1xi32> to vector<40x128xi32>
    %15 = arith.cmpi eq, %13, %14 : vector<40x128xi32>
    %cst_5 = arith.constant 0.000000e+00 : f32
    %16 = vector.broadcast %cst_5 : f32 to vector<40x128xf32>
    %17 = arith.select %15, %0, %16 : vector<40x128xi1>, vector<40x128xf32>
    %cst_6 = arith.constant dense<0.000000e+00> : vector<40xf32>
    %18 = vector.multi_reduction <add>, %17, %cst_6 [1] : vector<40x128xf32> to vector<40xf32>
    %19 = vector.shape_cast %18 : vector<40xf32> to vector<40x1xf32>
    %20 = vector.extract_strided_slice %0 {offsets = [0, 0], sizes = [40, 1], strides = [1, 1]} : vector<40x128xf32> to vector<40x1xf32>
    %21 = arith.subf %19, %10 : vector<40x1xf32>
    %22 = arith.subf %20, %10 : vector<40x1xf32>
    %cst_7 = arith.constant 1.280000e+02 : f32
    %23 = vector.broadcast %cst_7 : f32 to vector<40x1xf32>
    %24 = arith.mulf %23, %10 : vector<40x1xf32>
    %25 = arith.subf %12, %24 : vector<40x1xf32>
    %cst_8 = arith.constant 0.899212599 : f32
    %26 = vector.broadcast %cst_8 : f32 to vector<40x1xf32>
    %27 = arith.mulf %26, %21 : vector<40x1xf32>
    %28 = arith.subf %25, %22 : vector<40x1xf32>
    %cst_9 = arith.constant 7.87401571E-4 : f32
    %29 = vector.broadcast %cst_9 : f32 to vector<40x1xf32>
    %30 = arith.mulf %29, %28 : vector<40x1xf32>
    %31 = arith.addf %27, %30 : vector<40x1xf32>
    %cst_10 = arith.constant 0.000000e+00 : f32
    %32 = vector.broadcast %cst_10 : f32 to vector<40x1xf32>
    %33 = arith.subf %32, %31 : vector<40x1xf32>
    %c40_i32 = arith.constant 40 : i32
    %34 = arith.muli %arg0, %c40_i32 : i32
    %35 = tpu.iota {dimensions = array<i32: 0>} : vector<40x1xi32>
    %36 = vector.broadcast %34 : i32 to vector<40x1xi32>
    %37 = arith.addi %36, %35 : vector<40x1xi32>
    %c0_i32 = arith.constant 0 : i32
    %38 = vector.broadcast %c0_i32 : i32 to vector<40x1xi32>
    %39 = arith.cmpi ne, %1, %38 : vector<40x1xi32>
    %c40_i32_11 = arith.constant 40 : i32
    %40 = vector.broadcast %c40_i32_11 : i32 to vector<40x1xi32>
    %41 = arith.cmpi slt, %37, %40 : vector<40x1xi32>
    %42 = arith.andi %39, %41 : vector<40x1xi1>
    %cst_12 = arith.constant 0.000000e+00 : f32
    %43 = vector.broadcast %cst_12 : f32 to vector<40x1xf32>
    %44 = arith.select %42, %33, %43 : vector<40x1xi1>, vector<40x1xf32>
    %45 = vector.shape_cast %44 : vector<40x1xf32> to vector<1x40x1xf32>
    %cst_13 = arith.constant dense<0.000000e+00> : vector<1xf32>
    %46 = vector.multi_reduction <add>, %45, %cst_13 [1, 2] : vector<1x40x1xf32> to vector<1xf32>
    %47 = vector.shape_cast %46 : vector<1xf32> to vector<1x1x1xf32>
    %48 = vector.extract %47[0, 0, 0] : f32 from vector<1x1x1xf32>
    %49 = vector.broadcast %48 : f32 to vector<8x128xf32>
    %c0_14 = arith.constant 0 : index
    %c0_15 = arith.constant 0 : index
    %50 = vector.load %arg3[%c0_14, %c0_15] : memref<8x128xf32, #tpu.memory_space<vmem>>, vector<8x128xf32>
    tpu.vector_store %arg3[%c0_14, %c0_15], %49 {strides = array<i32>} : memref<8x128xf32, #tpu.memory_space<vmem>>, vector<8x128xf32>,
    return
  }
  func.func @transform_0(%arg0: i32) -> (i32, i32) {
    %c0_i32 = arith.constant 0 : i32
    %c0_i32_0 = arith.constant 0 : i32
    return %arg0, %c0_i32 : i32, i32
  }
  func.func @transform_1(%arg0: i32) -> (i32, i32) {
    %c0_i32 = arith.constant 0 : i32
    %c0_i32_0 = arith.constant 0 : i32
    return %arg0, %c0_i32 : i32, i32
  }
  func.func @transform_2(%arg0: i32) -> (i32, i32) {
    %c0_i32 = arith.constant 0 : i32
    %c0_i32_0 = arith.constant 0 : i32
    return %arg0, %c0_i32 : i32, i32
  }
}

</mosaic_0001>

<bundles_post_ra>
// kernel: tpu_custom_call.1
= control target key start
LH: loop header
LB: loop body
LE: loop exit
PB: predicated region body
PF: predicated region fallthrough
CT: control target
= control target key end

     0   :  { %v280_v4 = vmov 0   ;;  %s412_s0 = inlined_call_operand.vmem [shape: f32[40,128], index: 0, kind: input, shape index: {}]   ;;  %s413_s1 = inlined_call_operand.vmem [shape: s32[40,1], index: 1, kind: input, shape index: {}]   ;;  %s414_s2 = inlined_call_operand.hbm [shape: f32[8,128], index: 2, kind: output, shape index: {}]  }
   0x1   :  { %v300_v0 = vld [vmem:[%s412_s0] sm:$0xff]  ;;  %v305_v1 = vld [vmem:[%s412_s0 + $0x10] sm:$0xff]  ;;  %v312_v2 = vld [vmem:[%s412_s0 + $0x8] sm:$0xff]  ;;  %236 = vset.pattern.permute.xlu1 %v280_v4  ;;  %237 = vset.pattern.permute.xlu0 %v280_v4 }
   0x2   :  { %22 = vmax.xlane.f32.xlu0 %v300_v0  ;;  %26 = vmax.xlane.f32.xlu1 %v305_v1  ;;  %v317_v3 = vld [vmem:[%s412_s0 + $0x18] sm:$0xff] }
   0x3   :  { %7 = vsyncpa [#allocation3], 0  ;;  %v324_v5 = vld [vmem:[%s412_s0 + $0x20] sm:$0xff]  ;;  %v336_v7 = vld [vmem:[%s413_s1 + $0x10] sm:$0xff]  ;;  %v82_v26 = vlaneseq  ;;  %vm197_vm7 = vcmask 7168  }
   0x4   :  { %v330_v6 = vld [vmem:[%s413_s1] sm:$0xff]  ;;  %v342_v8 = vld [vmem:[%s413_s1 + $0x18] sm:$0xff]  ;;  %v347_v9 = vld [vmem:[%s413_s1 + $0x8] sm:$0xff]  ;;  %vm179_vm8 = vcmp.ne.s32.totalorder %v336_v7, 0 }
   0x5   :  { %v353_v10 = vld [vmem:[%s413_s1 + $0x20] sm:$0xff]  ;;  %v83_v30 = vand.u32 127, %v82_v26  ;;  %vm177_vm5 = vcmp.ne.s32.totalorder %v330_v6, 0  ;;  %vm178_vm6 = vcmp.ne.s32.totalorder %v347_v9, 0  ;;  %vm180_vm9 = vcmp.ne.s32.totalorder %v342_v8, 0  ;;  %s281_s1 = smov [#allocation2]  }
   0x6   :  { %24 = vmax.xlane.f32.xlu0 %v312_v2  ;;  %28 = vmax.xlane.f32.xlu1 %v317_v3  ;;  %vm181_vm10 = vcmp.ne.s32.totalorder %v353_v10, 0  ;;  %s224_s28 = sshll.u32 %s281_s1, 4  ;;  %s225_s28 = int_to_ptr.vmem [resolvable:$true] %s224_s28 }
   0x7   :  { %s258_s30 = scalar_lea.vmem %s225_s28, 128  ;;  %p263_p1 = scmp.lt.s32.totalorder %s225_s28, %s225_s28 }
   0x8   :  { %p259_p0 = scmp.ne.s32.totalorder %s225_s28, %s258_s30  ;;  %p264_p2 = scmp.lt.s32.totalorder %s258_s30, %s258_s30 }
   0xa   :  { %30 = vmax.xlane.f32.xlu0 %v324_v5  ;;  %p265_p3 = por %p264_p2, %p263_p1 }
   0xc   :  { %p266_p4 = pnand %p265_p3, %p259_p0 }
  0x17   :  { %85 = vperm.xlu1 %236, %v330_v6  }
  0x1b   :  { %91 = vperm.xlu1 %236, %v336_v7  }
  0x1f   :  { %94 = vperm.xlu1 %236, %v342_v8  }
  0x20   :  { %88 = vperm.xlu0 %237, %v347_v9  }
  0x23   :  { %97 = vperm.xlu1 %236, %v353_v10  }
  0x8b   :  { %v357_v11 = vpop.xlane.xlu0 %22  ;;  %v359_v12 = vpop.xlane.xlu1 %26 }
  0x8c   :  { %v32_v13 = vsub.f32 %v300_v0, %v357_v11  ;;  %v34_v14 = vsub.f32 %v305_v1, %v359_v12 }
  0x8e   :  { %v37_v15 = vmul.f32 1.442695, %v32_v13  ;;  %v41_v16 = vmul.f32 1.442695, %v34_v14 }
  0x8f   :  { %v365_v17 = vpop.xlane.xlu0 %24  ;;  %v367_v18 = vpop.xlane.xlu1 %28 }
  0x90   :  { %238 = vpow2.f32 %v37_v15  ;;  %v33_v19 = vsub.f32 %v312_v2, %v365_v17  ;;  %v35_v20 = vsub.f32 %v317_v3, %v367_v18 }
  0x91   :  { %240 = vpow2.f32 %v41_v16 }
  0x92   :  { %v39_v21 = vmul.f32 1.442695, %v33_v19  ;;  %v43_v22 = vmul.f32 1.442695, %v35_v20 }
  0x93   :  { %v373_v23 = vpop.xlane.xlu0 %30  ;;  %v86_v28 = vpop.permute.xlu1 %85 }
  0x94   :  { %242 = vpow2.f32 %v39_v21  ;;  %v36_v24 = vsub.f32 %v324_v5, %v373_v23  ;;  %vm99_vm0 = vcmp.eq.s32.totalorder %v83_v30, %v86_v28 }
  0x95   :  { %244 = vpow2.f32 %v43_v22  ;;  %v104_v35 = vsel %vm99_vm0, %v300_v0, 0.0 }
  0x96   :  { %v45_v25 = vmul.f32 1.442695, %v36_v24 }
  0x97   :  { %v92_v33 = vpop.permute.xlu1 %91 }
  0x98   :  { %246 = vpow2.f32 %v45_v25  ;;  %vm101_vm3 = vcmp.eq.s32.totalorder %v83_v30, %v92_v33 }
  0x99   :  { %v106_v41 = vsel %vm101_vm3, %v305_v1, 0.0 }
  0x9b   :  { %v95_v36 = vpop.permute.xlu1 %94  ;;  %v89_v37 = vpop.permute.xlu0 %88 }
  0x9c   :  { %vm100_vm1 = vcmp.eq.s32.totalorder %v83_v30, %v89_v37  ;;  %vm102_vm4 = vcmp.eq.s32.totalorder %v83_v30, %v95_v36 }
  0x9d   :  { %v239_v27 = vpop.eup %238  ;;  %v105_v39 = vsel %vm100_vm1, %v312_v2, 0.0  ;;  %v107_v42 = vsel %vm102_vm4, %v317_v3, 0.0 }
  0x9e   :  { %47 = vadd.xlane.f32.xlu1 %v239_v27  ;;  %v241_v29 = vpop.eup %240 }
  0x9f   :  { %v98_v38 = vpop.permute.xlu1 %97 }
  0xa0   :  { %vm103_vm2 = vcmp.eq.s32.totalorder %v83_v30, %v98_v38 }
  0xa1   :  { %v243_v31 = vpop.eup %242  ;;  %v108_v40 = vsel %vm103_vm2, %v324_v5, 0.0 }
  0xa2   :  { %51 = vadd.xlane.f32.xlu1 %v241_v29  ;;  %49 = vadd.xlane.f32.xlu0 %v243_v31  ;;  %v245_v32 = vpop.eup %244 }
  0xa5   :  { %v247_v34 = vpop.eup %246 }
  0xa6   :  { %53 = vadd.xlane.f32.xlu1 %v245_v32  ;;  %74 = vadd.xlane.f32.xlu0 %v312_v2 }
  0xaa   :  { %55 = vadd.xlane.f32.xlu1 %v247_v34  ;;  %109 = vadd.xlane.f32.xlu0 %v104_v35 }
  0xae   :  { %72 = vadd.xlane.f32.xlu1 %v300_v0  ;;  %78 = vadd.xlane.f32.xlu0 %v317_v3 }
  0xb2   :  { %76 = vadd.xlane.f32.xlu1 %v305_v1  ;;  %80 = vadd.xlane.f32.xlu0 %v324_v5 }
  0xb6   :  { %111 = vadd.xlane.f32.xlu1 %v105_v39  ;;  %117 = vadd.xlane.f32.xlu0 %v108_v40 }
  0xba   :  { %113 = vadd.xlane.f32.xlu1 %v106_v41 }
  0xbe   :  { %115 = vadd.xlane.f32.xlu1 %v107_v42 }
 0x127   :  { %v48_v43 = vpop.xlane.xlu1 %47 }
 0x128   :  { %248 = vlog2.f32 %v48_v43 }
 0x12b   :  { %v52_v44 = vpop.xlane.xlu1 %51  ;;  %v50_v45 = vpop.xlane.xlu0 %49 }
 0x12c   :  { %250 = vlog2.f32 %v52_v44 }
 0x12d   :  { %252 = vlog2.f32 %v50_v45 }
 0x12f   :  { %v54_v46 = vpop.xlane.xlu1 %53  ;;  %v75_v47 = vpop.xlane.xlu0 %74 }
 0x130   :  { %254 = vlog2.f32 %v54_v46 }
 0x133   :  { %v56_v48 = vpop.xlane.xlu1 %55  ;;  %v110_v50 = vpop.xlane.xlu0 %109 }
 0x134   :  { %256 = vlog2.f32 %v56_v48 }
 0x135   :  { %v249_v49 = vpop.eup %248 }
 0x136   :  { %v58_v51 = vmul.f32 0.6931472, %v249_v49 }
 0x137   :  { %v73_v52 = vpop.xlane.xlu1 %72  ;;  %v79_v59 = vpop.xlane.xlu0 %78 }
 0x138   :  { %v67_v53 = vadd.f32 %v58_v51, %v357_v11 }
 0x139   :  { %v251_v54 = vpop.eup %250 }
 0x13a   :  { %v253_v55 = vpop.eup %252  ;;  %v62_v56 = vmul.f32 0.6931472, %v251_v54  ;;  %v129_v57 = vmul.f32 128.0, %v67_v53  ;;  %v119_v62 = vsub.f32 %v110_v50, %v67_v53  ;;  %v124_v63 = vsub.f32 %v300_v0, %v67_v53 }
 0x13b   :  { %v60_v58 = vmul.f32 0.6931472, %v253_v55  ;;  %v77_v60 = vpop.xlane.xlu1 %76  ;;  %v81_v28 = vpop.xlane.xlu0 %80 }
 0x13c   :  { %v69_v61 = vadd.f32 %v62_v56, %v359_v12  ;;  %v134_v4 = vsub.f32 %v73_v52, %v129_v57  ;;  %v139_v22 = vmul.f32 0.8992126, %v119_v62 }
 0x13d   :  { %v255_v13 = vpop.eup %254  ;;  %v68_v14 = vadd.f32 %v60_v58, %v365_v17 }
 0x13e   :  { %v64_v15 = vmul.f32 0.6931472, %v255_v13  ;;  %v144_v16 = vsub.f32 %v134_v4, %v124_v63  ;;  %v131_v19 = vmul.f32 128.0, %v69_v61  ;;  %v126_v0 = vsub.f32 %v305_v1, %v69_v61 }
 0x13f   :  { %v130_v11 = vmul.f32 128.0, %v68_v14  ;;  %v112_v20 = vpop.xlane.xlu1 %111  ;;  %v125_v12 = vsub.f32 %v312_v2, %v68_v14  ;;  %v118_v43 = vpop.xlane.xlu0 %117 }
 0x140   :  { %v70_v21 = vadd.f32 %v64_v15, %v367_v18  ;;  %v149_v24 = vmul.f32 0.0007874016, %v144_v16  ;;  %v136_v25 = vsub.f32 %v77_v60, %v131_v19  ;;  %v120_v29 = vsub.f32 %v112_v20, %v68_v14 }
 0x141   :  { %v257_v26 = vpop.eup %256  ;;  %v135_v27 = vsub.f32 %v75_v47, %v130_v11 }
 0x142   :  { %v66_v30 = vmul.f32 0.6931472, %v257_v26  ;;  %v154_v17 = vadd.f32 %v149_v24, %v139_v22  ;;  %v132_v31 = vmul.f32 128.0, %v70_v21  ;;  %v127_v33 = vsub.f32 %v317_v3, %v70_v21 }
 0x143   :  { %v145_v32 = vsub.f32 %v135_v27, %v125_v12  ;;  %v146_v18 = vsub.f32 %v136_v25, %v126_v0  ;;  %v114_v34 = vpop.xlane.xlu1 %113  ;;  %v140_v39 = vmul.f32 0.8992126, %v120_v29 }
 0x144   :  { %v71_v35 = vadd.f32 %v66_v30, %v373_v23  ;;  %v159_v36 = vsub.f32 0.0, %v154_v17  ;;  %v137_v37 = vsub.f32 %v79_v59, %v132_v31  ;;  %v121_v2 = vsub.f32 %v114_v34, %v69_v61 }
 0x145   :  { %v150_v38 = vmul.f32 0.0007874016, %v145_v32  ;;  %v151_v42 = vmul.f32 0.0007874016, %v146_v18 }
 0x146   :  { %v147_v1 = vsub.f32 %v137_v37, %v127_v33  ;;  %v133_v40 = vmul.f32 128.0, %v71_v35  ;;  %v192_v41 = vsel %vm177_vm5, %v159_v36, 0.0  ;;  %v141_v44 = vmul.f32 0.8992126, %v121_v2 }
 0x147   :  { %v155_v6 = vadd.f32 %v150_v38, %v140_v39  ;;  %v116_v3 = vpop.xlane.xlu1 %115  ;;  %v128_v45 = vsub.f32 %v324_v5, %v71_v35  ;;  %v123_v23 = vsub.f32 %v118_v43, %v71_v35  ;;  %v198_v55 = vsel %vm197_vm7, %v192_v41, 0.0 }
 0x148   :  { %v138_v46 = vsub.f32 %v81_v28, %v133_v40  ;;  %v122_v47 = vsub.f32 %v116_v3, %v70_v21  ;;  %v156_v49 = vadd.f32 %v151_v42, %v141_v44  ;;  %v152_v50 = vmul.f32 0.0007874016, %v147_v1 }
 0x149   :  { %v160_v48 = vsub.f32 0.0, %v155_v6  ;;  %v143_v5 = vmul.f32 0.8992126, %v123_v23 }
 0x14a   :  { %v148_v51 = vsub.f32 %v138_v46, %v128_v45  ;;  %v142_v52 = vmul.f32 0.8992126, %v122_v47  ;;  %v161_v54 = vsub.f32 0.0, %v156_v49 }
 0x14b   :  { %v193_v53 = vsel %vm178_vm6, %v160_v48, 0.0 }
 0x14c   :  { %v153_v56 = vmul.f32 0.0007874016, %v148_v51  ;;  %v199_v57 = vsel %vm197_vm7, %v193_v53, 0.0  ;;  %v157_v58 = vadd.f32 %v152_v50, %v142_v52  ;;  %v194_v59 = vsel %vm179_vm8, %v161_v54, 0.0 }
 0x14d   :  { %v200_v60 = vadd.f32 %v199_v57, %v198_v55  ;;  %v201_v62 = vsel %vm197_vm7, %v194_v59, 0.0 }
 0x14e   :  { %v158_v61 = vadd.f32 %v153_v56, %v143_v5  ;;  %v162_v7 = vsub.f32 0.0, %v157_v58 }
 0x14f   :  { %v202_v9 = vadd.f32 %v201_v62, %v200_v60 }
 0x150   :  { %v163_v63 = vsub.f32 0.0, %v158_v61  ;;  %v195_v4 = vsel %vm180_vm9, %v162_v7, 0.0 }
 0x151   :  { %v203_v13 = vsel %vm197_vm7, %v195_v4, 0.0 }
 0x152   :  { %v196_v14 = vsel %vm181_vm10, %v163_v63, 0.0  ;;  %v204_v15 = vadd.f32 %v203_v13, %v202_v9 }
 0x153   :  { %v205_v16 = vsel %vm197_vm7, %v196_v14, 0.0 }
 0x154   :  { %v206_v19 = vadd.f32 %v205_v16, %v204_v15 }
 0x156   :  { %207 = vadd.xlane.f32.xlu1 %v206_v19 }
 0x1df   :  { %v208_v8 = vpop.xlane.xlu1 %207 }
 0x1e0   :  { %v209_v11 = vrot.slane %v208_v8, 4 }
 0x1e2   :  { %v210_v20 = vadd.f32 %v209_v11, %v208_v8 }
 0x1e4   :  { %v211_v21 = vrot.slane %v210_v20, 2 }
 0x1e6   :  { %v212_v22 = vadd.f32 %v211_v21, %v210_v20 }
 0x1e8   :  { %v213_v24 = vrot.slane %v212_v22, 1 }
 0x1ea   :  { %v214_v25 = vadd.f32 %v213_v24, %v212_v22 }
 0x1ec   :  { %232 = vpush %v214_v25 }
 0x21d   :  { %s233_s29 = spop %232 }
 0x21e   :  { %v216_v10 = vstv %s233_s29 }
 0x21f   :  { %217 = vst [vmem:[#allocation2] sm:$0xff] %v216_v10 }
 0x220   :  { %269 = shalt.err (!%p266_p4)
}
 0x221   :  { %227 = dma.vmem_to_hbm [thread:$0]  %s225_s28, 128, %s414_s2, [#allocation3]  }
 0x222   :  { %278 = dma.done.wait [#allocation3], 128  }
 0x223   :  { %279 = vsyncadd [#allocation3], 4294967168 }
 0x224   :  { %231 = vsyncpa [#allocation3], 1 }

</bundles_post_ra>
